<compile_context>
chip_gen: v6e
topology: v6e:2x2x1
jax: 0.10.0
libtpu: 0.0.40
codegen_flags: <defaults>
</compile_context>

<pallas_src>
import functools

import jax
import jax.numpy as jnp
from jax.experimental import pallas as pl
from jax.experimental.pallas import tpu as pltpu


def _round_up(x, m):
    return ((x + m - 1) // m) * m


def _cdiv(a, b):
    return -(-a // b)


def _block_vmem_bytes(c, dtype, t):
    """VMEM footprint of one (C, T) block, including sublane padding."""
    itemsize = jnp.dtype(dtype).itemsize
    granule = 8 * max(1, 4 // itemsize)       # f32: 8, bf16: 16, int8: 32
    return _round_up(max(int(c), 1), granule) * t * itemsize


def _hel_kernel(
    pred_affs_ref, gt_affs_ref, affs_w_ref,
    pred_lsds_ref, gt_lsds_ref, lsds_w_ref,
    pred_bdt_ref, gt_bdt_ref, labels_mask_ref,
    pred_hardness_ref,
    out_ref,
    *, k_aff, k_lsd, k_bdt, w_hardness, tile, tiles_per_group, num_pixels,
):
    """Grid = (batch, pixel_group, pixel_tile).

    Channel refs are (C, T) (batch dim squeezed); hardness and the output
    accumulator block are (1, T).  The output block index is constant along
    the last ("arbitrary") axis -> VMEM-resident vector accumulator; the
    cross-lane reduction to a scalar happens once, outside the pallas_call.
    """
    g = pl.program_id(1)
    tt = pl.program_id(2)
    f32 = jnp.float32

    hard = pred_hardness_ref[...].astype(f32)                           # (1, T)

    # _scaled_mse numerators, summed over channels (mean folded into k_*).
    da = pred_affs_ref[...].astype(f32) - gt_affs_ref[...].astype(f32)
    sa = jnp.sum(affs_w_ref[...].astype(f32) * da * da,
                 axis=0, keepdims=True)                                  # (1, T)

    dl = pred_lsds_ref[...].astype(f32) - gt_lsds_ref[...].astype(f32)
    sl = jnp.sum(lsds_w_ref[...].astype(f32) * dl * dl,
                 axis=0, keepdims=True)                                  # (1, T)

    db = pred_bdt_ref[...].astype(f32) - gt_bdt_ref[...].astype(f32)
    sb = jnp.sum(labels_mask_ref[...].astype(f32) * db * db,
                 axis=0, keepdims=True)                                  # (1, T)

    # total_seg_loss_map = hard * (w_aff*mean_aff + w_lsd*mean_lsd + w_bdt*mean_bdt)
    # hardness_loss_map  = -w_hardness * hard * (w_bdt * mean_bdt * hard)
    seg = k_aff * sa + k_lsd * sl + k_bdt * sb                           # (1, T)
    total = hard * seg - (w_hardness * k_bdt) * (hard * hard) * sb       # (1, T)

    # Tail / overflow masking (replaces wrapper-side zero padding).  The
    # out-of-range part of an edge block is undefined for ALL streams, so the
    # per-pixel loss must be explicitly zeroed before accumulation.
    pix0 = (g * tiles_per_group + tt) * tile
    lane = jax.lax.broadcasted_iota(jnp.int32, total.shape, dimension=1)
    total = jnp.where(pix0 + lane < num_pixels, total, 0.0)

    @pl.when(tt == 0)
    def _():
        out_ref[...] = jnp.zeros_like(out_ref)

    out_ref[...] += total


def hardness_enhanced_loss(
    pred_affs, gt_affs, affs_weights,
    pred_lsds, gt_lsds, lsds_weights,
    pred_boundary_distmap, gt_boundary_distmap, gt_labels_mask,
    pred_hardness,
    loss_term_weights,
    normalize_weights=True,
    pixel_tile=32768,       # target lane-dense tile (multiple of 128)
    num_pixel_groups=2,     # v7x: 2 TensorCores per chip
    vmem_budget=32 << 20,   # keep the double-buffered working set under this
):
    # --- module __init__ behavior: weight normalization ---
    if normalize_weights:
        s = sum(loss_term_weights.values())
        loss_term_weights = {k: v / s for k, v in loss_term_weights.items()}

    N, C_aff, H, W = pred_affs.shape
    C_lsd = pred_lsds.shape[1]
    C_bdt = pred_boundary_distmap.shape[1]
    P = H * W

    # --- metadata-only reshapes (no HBM pass, no padding) ---
    pa = pred_affs.reshape(N, C_aff, P)
    ga = gt_affs.reshape(N, C_aff, P)
    aw = affs_weights.reshape(N, C_aff, P)
    pls = pred_lsds.reshape(N, C_lsd, P)
    gls = gt_lsds.reshape(N, C_lsd, P)
    lw = lsds_weights.reshape(N, C_lsd, P)
    pb = pred_boundary_distmap.reshape(N, C_bdt, P)
    gb = gt_boundary_distmap.reshape(N, C_bdt, P)
    # gt_labels_mask.to(dtype) is done in-kernel; keep it narrow (int8) in HBM.
    mask = gt_labels_mask.reshape(N, C_bdt, P).astype(jnp.int8)
    hard = pred_hardness.reshape(N, 1, P)

    streams = [
        (C_aff, pa.dtype), (C_aff, ga.dtype), (C_aff, aw.dtype),
        (C_lsd, pls.dtype), (C_lsd, gls.dtype), (C_lsd, lw.dtype),
        (C_bdt, pb.dtype), (C_bdt, gb.dtype), (C_bdt, mask.dtype),
        (1, hard.dtype),
    ]

    def working_set_bytes(t):
        per_step = sum(_block_vmem_bytes(c, dt, t) for c, dt in streams)
        per_step += _block_vmem_bytes(1, jnp.float32, t)   # output block
        return 2 * per_step                                 # double-buffered

    # --- lane-dense pixel tile; shrink if VMEM working set would be too big ---
    T = min(pixel_tile, _round_up(P, 128))
    T = _round_up(T, 128)
    while T > 1024 and working_set_bytes(T) > vmem_budget:
        T = max(1024, _round_up(T // 2, 128))
    NT = _cdiv(P, T)

    # --- v7x megacore: split pixel-tile axis when batch-parallelism is thin.
    # Only do it when the wasted (fully masked) step fraction is negligible,
    # so single-TC chips (v5e/v6e) don't pay extra DMA traffic.
    G = 1
    if num_pixel_groups > 1 and NT > 1 and not (N >= 2 and N % 2 == 0):
        if NT % num_pixel_groups == 0 or NT >= 8 * num_pixel_groups:
            G = min(num_pixel_groups, NT)
    TPG = _cdiv(NT, G)
    last_tile = NT - 1

    def _tile_idx(g, t):
        tg = g * TPG + t
        if G == 1:
            return tg
        # Overflow steps (tg >= NT) re-fetch the last tile; the kernel's
        # pixel mask zeroes their contribution entirely.
        return jnp.minimum(tg, last_tile)

    def chan_spec(c):
        return pl.BlockSpec((pl.Squeezed(), c, T),
                            lambda n, g, t: (n, 0, _tile_idx(g, t)))

    hard_spec = pl.BlockSpec((pl.Squeezed(), 1, T),
                             lambda n, g, t: (n, 0, _tile_idx(g, t)))
    # Output block index constant along the pixel-tile axis -> VMEM-resident
    # per-(batch, group) accumulator (pixel axis must stay "arbitrary").
    out_spec = pl.BlockSpec((pl.Squeezed(), pl.Squeezed(), 1, T),
                            lambda n, g, t: (n, g, 0, 0))

    kernel = functools.partial(
        _hel_kernel,
        k_aff=float(loss_term_weights['aff']) / C_aff,   # weight * mean_over_C
        k_lsd=float(loss_term_weights['lsd']) / C_lsd,
        k_bdt=float(loss_term_weights['bdt']) / C_bdt,
        w_hardness=float(loss_term_weights['hardness']),
        tile=T, tiles_per_group=TPG, num_pixels=P,
    )

    inputs = (pa, ga, aw, pls, gls, lw, pb, gb, mask, hard)
    bytes_accessed = (sum(int(x.size) * x.dtype.itemsize for x in inputs)
                      + N * G * T * 4)
    flops = int(N * P * (4 * (C_aff + C_lsd + C_bdt) + 14))

    ws = working_set_bytes(T)
    vmem_limit = max(16 << 20, min(int(ws * 1.25) + (2 << 20), 48 << 20))

    grid_spec = pltpu.PrefetchScalarGridSpec(
        num_scalar_prefetch=0,
        grid=(N, G, TPG),
        in_specs=[
            chan_spec(C_aff), chan_spec(C_aff), chan_spec(C_aff),
            chan_spec(C_lsd), chan_spec(C_lsd), chan_spec(C_lsd),
            chan_spec(C_bdt), chan_spec(C_bdt), chan_spec(C_bdt),
            hard_spec,
        ],
        out_specs=out_spec,
    )

    partials = pl.pallas_call(
        kernel,
        out_shape=jax.ShapeDtypeStruct((N, G, 1, T), jnp.float32),
        grid_spec=grid_spec,
        compiler_params=pltpu.CompilerParams(
            dimension_semantics=("parallel", "parallel", "arbitrary"),
            vmem_limit_bytes=vmem_limit,
        ),
        cost_estimate=pl.CostEstimate(
            flops=flops, transcendentals=0, bytes_accessed=int(bytes_accessed)),
    )(*inputs)

    # torch.mean over the whole (N, H, W) total_loss_map; masked-out lanes
    # and overflow steps contributed exactly 0 to every accumulator block.
    return jnp.sum(partials) / jnp.float32(N * H * W)


def _reference(pred_affs, gt_affs, affs_weights,
               pred_lsds, gt_lsds, lsds_weights,
               pred_bdt, gt_bdt, gt_labels_mask,
               pred_hardness, loss_term_weights):
    s = sum(loss_term_weights.values())
    ltw = {k: v / s for k, v in loss_term_weights.items()}
    mask_w = gt_labels_mask.astype(affs_weights.dtype)

    aff_map = jnp.mean(affs_weights * (pred_affs - gt_affs) ** 2, axis=1) * pred_hardness
    lsd_map = jnp.mean(lsds_weights * (pred_lsds - gt_lsds) ** 2, axis=1) * pred_hardness
    bdt_map = jnp.mean(mask_w * (pred_bdt - gt_bdt) ** 2, axis=1) * pred_hardness

    total_seg = ltw['aff'] * aff_map + ltw['lsd'] * lsd_map + ltw['bdt'] * bdt_map
    hardness_relevant = ltw['bdt'] * bdt_map
    hardness_loss = -pred_hardness * hardness_relevant * ltw['hardness']
    return jnp.mean(total_seg + hardness_loss)


if __name__ == "__main__":
    loss_term_weights = {'aff': 1.0, 'lsd': 1.0, 'bdt': 1.0, 'hardness': 0.1}

    def build(key, N, H, W, C_AFF=3, C_LSD=6, C_BDT=1):
        ks = jax.random.split(key, 10)
        pred_affs = jax.random.normal(ks[0], (N, C_AFF, H, W), jnp.float32)
        gt_affs = (jax.random.uniform(ks[1], (N, C_AFF, H, W)) > 0.5).astype(jnp.float32)
        affs_weights = jax.random.uniform(ks[2], (N, C_AFF, H, W), dtype=jnp.float32)
        pred_lsds = jax.random.normal(ks[3], (N, C_LSD, H, W), jnp.float32)
        gt_lsds = jax.random.uniform(ks[4], (N, C_LSD, H, W), dtype=jnp.float32)
        lsds_weights = jax.random.uniform(ks[5], (N, C_LSD, H, W), dtype=jnp.float32)
        pred_bdt = jax.random.normal(ks[6], (N, C_BDT, H, W), jnp.float32)
        gt_bdt = jax.random.normal(ks[7], (N, C_BDT, H, W), jnp.float32)
        gt_labels_mask = jax.random.uniform(ks[8], (N, C_BDT, H, W)) > 0.2  # bool
        pred_hardness = jax.nn.softplus(
            jax.random.normal(ks[9], (N, H, W), jnp.float32))
        return (pred_affs, gt_affs, affs_weights, pred_lsds, gt_lsds, lsds_weights,
                pred_bdt, gt_bdt, gt_labels_mask, pred_hardness)

    key = jax.random.PRNGKey(0)
    k1, k2 = jax.random.split(key)

    # Case 1: small, single tile (T == P == 256), batch-parallel only.
    args1 = build(k1, N=2, H=16, W=16)
    loss1 = jax.block_until_ready(hardness_enhanced_loss(*args1, loss_term_weights))
    ref1 = _reference(*args1, loss_term_weights)
    assert jnp.allclose(loss1, ref1, rtol=1e-4, atol=1e-6), (loss1, ref1)

    # Case 2: odd batch, non-divisible pixel count (P=2401, T=128 -> NT=19):
    # exercises the in-kernel tail mask, the v7x pixel-group split (G=2,
    # TPG=10) and the clamped, fully-masked overflow step.
    args2 = build(k2, N=1, H=49, W=49)
    loss2 = jax.block_until_ready(
        hardness_enhanced_loss(*args2, loss_term_weights,
                               pixel_tile=128, num_pixel_groups=2))
    ref2 = _reference(*args2, loss_term_weights)
    assert jnp.allclose(loss2, ref2, rtol=1e-4, atol=1e-6), (loss2, ref2)

    # TODO(synk): the 'bce' (per-pixel cross-entropy) term and the oob-masking
    # branch (torch.masked_select) are disabled by this config and not lowered.
    print("KERNEL_OK")
</pallas_src>

<mosaic_0001>
module attributes {stable_mosaic.version = 11 : i64} {
  func.func @_hel_kernel(%arg0: i32, %arg1: i32, %arg2: i32, %arg3: memref<1x3x256xf32, #tpu.memory_space<vmem>>, %arg4: memref<1x3x256xf32, #tpu.memory_space<vmem>>, %arg5: memref<1x3x256xf32, #tpu.memory_space<vmem>>, %arg6: memref<1x6x256xf32, #tpu.memory_space<vmem>>, %arg7: memref<1x6x256xf32, #tpu.memory_space<vmem>>, %arg8: memref<1x6x256xf32, #tpu.memory_space<vmem>>, %arg9: memref<1x1x256xf32, #tpu.memory_space<vmem>>, %arg10: memref<1x1x256xf32, #tpu.memory_space<vmem>>, %arg11: memref<1x1x256xi8, #tpu.memory_space<vmem>>, %arg12: memref<1x1x256xf32, #tpu.memory_space<vmem>>, %arg13: memref<1x1x1x256xf32, #tpu.memory_space<vmem>>) attributes {dimension_semantics = [#tpu.dimension_semantics<parallel>, #tpu.dimension_semantics<parallel>, #tpu.dimension_semantics<arbitrary>], iteration_bounds = array<i64: 2, 1, 1>, scalar_prefetch = 0 : i64, scratch_operands = 0 : i64, tpu.core_type = #tpu.core_type<tc>, window_params = [{transform_indices = @transform_0, window_bounds = array<i64: 1, 3, 256>}, {transform_indices = @transform_1, window_bounds = array<i64: 1, 3, 256>}, {transform_indices = @transform_2, window_bounds = array<i64: 1, 3, 256>}, {transform_indices = @transform_3, window_bounds = array<i64: 1, 6, 256>}, {transform_indices = @transform_4, window_bounds = array<i64: 1, 6, 256>}, {transform_indices = @transform_5, window_bounds = array<i64: 1, 6, 256>}, {transform_indices = @transform_6, window_bounds = array<i64: 1, 1, 256>}, {transform_indices = @transform_7, window_bounds = array<i64: 1, 1, 256>}, {transform_indices = @transform_8, window_bounds = array<i64: 1, 1, 256>}, {transform_indices = @transform_9, window_bounds = array<i64: 1, 1, 256>}, {transform_indices = @transform_10, window_bounds = array<i64: 1, 1, 1, 256>}]} {
    %c0 = arith.constant 0 : index
    %c0_0 = arith.constant 0 : index
    %c0_1 = arith.constant 0 : index
    %0 = vector.load %arg12[%c0, %c0_0, %c0_1] : memref<1x1x256xf32, #tpu.memory_space<vmem>>, vector<1x1x256xf32>
    %1 = vector.shape_cast %0 : vector<1x1x256xf32> to vector<1x256xf32>
    %c0_2 = arith.constant 0 : index
    %c0_3 = arith.constant 0 : index
    %c0_4 = arith.constant 0 : index
    %2 = vector.load %arg3[%c0_2, %c0_3, %c0_4] : memref<1x3x256xf32, #tpu.memory_space<vmem>>, vector<1x3x256xf32>
    %3 = vector.shape_cast %2 : vector<1x3x256xf32> to vector<3x256xf32>
    %c0_5 = arith.constant 0 : index
    %c0_6 = arith.constant 0 : index
    %c0_7 = arith.constant 0 : index
    %4 = vector.load %arg4[%c0_5, %c0_6, %c0_7] : memref<1x3x256xf32, #tpu.memory_space<vmem>>, vector<1x3x256xf32>
    %5 = vector.shape_cast %4 : vector<1x3x256xf32> to vector<3x256xf32>
    %6 = arith.subf %3, %5 : vector<3x256xf32>
    %c0_8 = arith.constant 0 : index
    %c0_9 = arith.constant 0 : index
    %c0_10 = arith.constant 0 : index
    %7 = vector.load %arg5[%c0_8, %c0_9, %c0_10] : memref<1x3x256xf32, #tpu.memory_space<vmem>>, vector<1x3x256xf32>
    %8 = vector.shape_cast %7 : vector<1x3x256xf32> to vector<3x256xf32>
    %9 = arith.mulf %8, %6 : vector<3x256xf32>
    %10 = arith.mulf %9, %6 : vector<3x256xf32>
    %cst = arith.constant dense<0.000000e+00> : vector<256xf32>
    %11 = vector.multi_reduction <add>, %10, %cst [0] : vector<3x256xf32> to vector<256xf32>
    %12 = vector.shape_cast %11 : vector<256xf32> to vector<1x256xf32>
    %c0_11 = arith.constant 0 : index
    %c0_12 = arith.constant 0 : index
    %c0_13 = arith.constant 0 : index
    %13 = vector.load %arg6[%c0_11, %c0_12, %c0_13] : memref<1x6x256xf32, #tpu.memory_space<vmem>>, vector<1x6x256xf32>
    %14 = vector.shape_cast %13 : vector<1x6x256xf32> to vector<6x256xf32>
    %c0_14 = arith.constant 0 : index
    %c0_15 = arith.constant 0 : index
    %c0_16 = arith.constant 0 : index
    %15 = vector.load %arg7[%c0_14, %c0_15, %c0_16] : memref<1x6x256xf32, #tpu.memory_space<vmem>>, vector<1x6x256xf32>
    %16 = vector.shape_cast %15 : vector<1x6x256xf32> to vector<6x256xf32>
    %17 = arith.subf %14, %16 : vector<6x256xf32>
    %c0_17 = arith.constant 0 : index
    %c0_18 = arith.constant 0 : index
    %c0_19 = arith.constant 0 : index
    %18 = vector.load %arg8[%c0_17, %c0_18, %c0_19] : memref<1x6x256xf32, #tpu.memory_space<vmem>>, vector<1x6x256xf32>
    %19 = vector.shape_cast %18 : vector<1x6x256xf32> to vector<6x256xf32>
    %20 = arith.mulf %19, %17 : vector<6x256xf32>
    %21 = arith.mulf %20, %17 : vector<6x256xf32>
    %cst_20 = arith.constant dense<0.000000e+00> : vector<256xf32>
    %22 = vector.multi_reduction <add>, %21, %cst_20 [0] : vector<6x256xf32> to vector<256xf32>
    %23 = vector.shape_cast %22 : vector<256xf32> to vector<1x256xf32>
    %c0_21 = arith.constant 0 : index
    %c0_22 = arith.constant 0 : index
    %c0_23 = arith.constant 0 : index
    %24 = vector.load %arg9[%c0_21, %c0_22, %c0_23] : memref<1x1x256xf32, #tpu.memory_space<vmem>>, vector<1x1x256xf32>
    %25 = vector.shape_cast %24 : vector<1x1x256xf32> to vector<1x256xf32>
    %c0_24 = arith.constant 0 : index
    %c0_25 = arith.constant 0 : index
    %c0_26 = arith.constant 0 : index
    %26 = vector.load %arg10[%c0_24, %c0_25, %c0_26] : memref<1x1x256xf32, #tpu.memory_space<vmem>>, vector<1x1x256xf32>
    %27 = vector.shape_cast %26 : vector<1x1x256xf32> to vector<1x256xf32>
    %28 = arith.subf %25, %27 : vector<1x256xf32>
    %c0_27 = arith.constant 0 : index
    %c0_28 = arith.constant 0 : index
    %c0_29 = arith.constant 0 : index
    %29 = vector.load %arg11[%c0_27, %c0_28, %c0_29] : memref<1x1x256xi8, #tpu.memory_space<vmem>>, vector<1x1x256xi8>
    %30 = vector.shape_cast %29 : vector<1x1x256xi8> to vector<1x256xi8>
    %31 = arith.sitofp %30 : vector<1x256xi8> to vector<1x256xf32>
    %32 = arith.mulf %31, %28 : vector<1x256xf32>
    %33 = arith.mulf %32, %28 : vector<1x256xf32>
    %cst_30 = arith.constant dense<0.000000e+00> : vector<256xf32>
    %34 = vector.multi_reduction <add>, %33, %cst_30 [0] : vector<1x256xf32> to vector<256xf32>
    %35 = vector.shape_cast %34 : vector<256xf32> to vector<1x256xf32>
    %cst_31 = arith.constant 0.107526883 : f32
    %36 = vector.broadcast %cst_31 : f32 to vector<1x256xf32>
    %37 = arith.mulf %36, %12 : vector<1x256xf32>
    %cst_32 = arith.constant 0.0537634417 : f32
    %38 = vector.broadcast %cst_32 : f32 to vector<1x256xf32>
    %39 = arith.mulf %38, %23 : vector<1x256xf32>
    %40 = arith.addf %37, %39 : vector<1x256xf32>
    %cst_33 = arith.constant 0.322580636 : f32
    %41 = vector.broadcast %cst_33 : f32 to vector<1x256xf32>
    %42 = arith.mulf %41, %35 : vector<1x256xf32>
    %43 = arith.addf %40, %42 : vector<1x256xf32>
    %44 = arith.mulf %1, %43 : vector<1x256xf32>
    %45 = arith.mulf %1, %1 : vector<1x256xf32>
    %cst_34 = arith.constant 0.0104058273 : f32
    %46 = vector.broadcast %cst_34 : f32 to vector<1x256xf32>
    %47 = arith.mulf %46, %45 : vector<1x256xf32>
    %48 = arith.mulf %47, %35 : vector<1x256xf32>
    %49 = arith.subf %44, %48 : vector<1x256xf32>
    %c1_i32 = arith.constant 1 : i32
    %50 = arith.muli %arg1, %c1_i32 : i32
    %51 = arith.addi %50, %arg2 : i32
    %c256_i32 = arith.constant 256 : i32
    %52 = arith.muli %51, %c256_i32 : i32
    %53 = tpu.iota {dimensions = array<i32: 1>} : vector<1x256xi32>
    %54 = vector.broadcast %52 : i32 to vector<1x256xi32>
    %55 = arith.addi %54, %53 : vector<1x256xi32>
    %c256_i32_35 = arith.constant 256 : i32
    %56 = vector.broadcast %c256_i32_35 : i32 to vector<1x256xi32>
    %57 = arith.cmpi slt, %55, %56 : vector<1x256xi32>
    %cst_36 = arith.constant 0.000000e+00 : f32
    %58 = vector.broadcast %cst_36 : f32 to vector<1x256xf32>
    %59 = arith.select %57, %49, %58 : vector<1x256xi1>, vector<1x256xf32>
    %c0_i32 = arith.constant 0 : i32
    %60 = arith.cmpi eq, %arg2, %c0_i32 : i32
    %61 = arith.extui %60 : i1 to i32
    %c0_i32_37 = arith.constant 0 : i32
    %62 = arith.cmpi ne, %61, %c0_i32_37 : i32
    scf.if %62 {
      %cst_46 = arith.constant 0.000000e+00 : f32
      %69 = vector.broadcast %cst_46 : f32 to vector<1x256xf32>
      %c0_47 = arith.constant 0 : index
      %c0_48 = arith.constant 0 : index
      %c0_49 = arith.constant 0 : index
      %c0_50 = arith.constant 0 : index
      %70 = vector.load %arg13[%c0_47, %c0_48, %c0_49, %c0_50] : memref<1x1x1x256xf32, #tpu.memory_space<vmem>>, vector<1x1x1x256xf32>
      %71 = vector.shape_cast %70 : vector<1x1x1x256xf32> to vector<1x256xf32>
      %72 = vector.shape_cast %69 : vector<1x256xf32> to vector<1x1x1x256xf32>
      tpu.vector_store %arg13[%c0_47, %c0_48, %c0_49, %c0_50], %72 {strides = array<i32>} : memref<1x1x1x256xf32, #tpu.memory_space<vmem>>, vector<1x1x1x256xf32>,
    } else {
    }
    %c0_38 = arith.constant 0 : index
    %c0_39 = arith.constant 0 : index
    %c0_40 = arith.constant 0 : index
    %c0_41 = arith.constant 0 : index
    %63 = vector.load %arg13[%c0_38, %c0_39, %c0_40, %c0_41] : memref<1x1x1x256xf32, #tpu.memory_space<vmem>>, vector<1x1x1x256xf32>
    %64 = vector.shape_cast %63 : vector<1x1x1x256xf32> to vector<1x256xf32>
    %65 = arith.addf %64, %59 : vector<1x256xf32>
    %c0_42 = arith.constant 0 : index
    %c0_43 = arith.constant 0 : index
    %c0_44 = arith.constant 0 : index
    %c0_45 = arith.constant 0 : index
    %66 = vector.load %arg13[%c0_42, %c0_43, %c0_44, %c0_45] : memref<1x1x1x256xf32, #tpu.memory_space<vmem>>, vector<1x1x1x256xf32>
    %67 = vector.shape_cast %66 : vector<1x1x1x256xf32> to vector<1x256xf32>
    %68 = vector.shape_cast %65 : vector<1x256xf32> to vector<1x1x1x256xf32>
    tpu.vector_store %arg13[%c0_42, %c0_43, %c0_44, %c0_45], %68 {strides = array<i32>} : memref<1x1x1x256xf32, #tpu.memory_space<vmem>>, vector<1x1x1x256xf32>,
    return
  }
  func.func @transform_0(%arg0: i32, %arg1: i32, %arg2: i32) -> (i32, i32, i32) {
    %c1_i32 = arith.constant 1 : i32
    %0 = arith.muli %arg1, %c1_i32 : i32
    %1 = arith.addi %0, %arg2 : i32
    %c0_i32 = arith.constant 0 : i32
    %c0_i32_0 = arith.constant 0 : i32
    return %arg0, %c0_i32, %1 : i32, i32, i32
  }
  func.func @transform_1(%arg0: i32, %arg1: i32, %arg2: i32) -> (i32, i32, i32) {
    %c1_i32 = arith.constant 1 : i32
    %0 = arith.muli %arg1, %c1_i32 : i32
    %1 = arith.addi %0, %arg2 : i32
    %c0_i32 = arith.constant 0 : i32
    %c0_i32_0 = arith.constant 0 : i32
    return %arg0, %c0_i32, %1 : i32, i32, i32
  }
  func.func @transform_2(%arg0: i32, %arg1: i32, %arg2: i32) -> (i32, i32, i32) {
    %c1_i32 = arith.constant 1 : i32
    %0 = arith.muli %arg1, %c1_i32 : i32
    %1 = arith.addi %0, %arg2 : i32
    %c0_i32 = arith.constant 0 : i32
    %c0_i32_0 = arith.constant 0 : i32
    return %arg0, %c0_i32, %1 : i32, i32, i32
  }
  func.func @transform_3(%arg0: i32, %arg1: i32, %arg2: i32) -> (i32, i32, i32) {
    %c1_i32 = arith.constant 1 : i32
    %0 = arith.muli %arg1, %c1_i32 : i32
    %1 = arith.addi %0, %arg2 : i32
    %c0_i32 = arith.constant 0 : i32
    %c0_i32_0 = arith.constant 0 : i32
    return %arg0, %c0_i32, %1 : i32, i32, i32
  }
  func.func @transform_4(%arg0: i32, %arg1: i32, %arg2: i32) -> (i32, i32, i32) {
    %c1_i32 = arith.constant 1 : i32
    %0 = arith.muli %arg1, %c1_i32 : i32
    %1 = arith.addi %0, %arg2 : i32
    %c0_i32 = arith.constant 0 : i32
    %c0_i32_0 = arith.constant 0 : i32
    return %arg0, %c0_i32, %1 : i32, i32, i32
  }
  func.func @transform_5(%arg0: i32, %arg1: i32, %arg2: i32) -> (i32, i32, i32) {
    %c1_i32 = arith.constant 1 : i32
    %0 = arith.muli %arg1, %c1_i32 : i32
    %1 = arith.addi %0, %arg2 : i32
    %c0_i32 = arith.constant 0 : i32
    %c0_i32_0 = arith.constant 0 : i32
    return %arg0, %c0_i32, %1 : i32, i32, i32
  }
  func.func @transform_6(%arg0: i32, %arg1: i32, %arg2: i32) -> (i32, i32, i32) {
    %c1_i32 = arith.constant 1 : i32
    %0 = arith.muli %arg1, %c1_i32 : i32
    %1 = arith.addi %0, %arg2 : i32
    %c0_i32 = arith.constant 0 : i32
    %c0_i32_0 = arith.constant 0 : i32
    return %arg0, %c0_i32, %1 : i32, i32, i32
  }
  func.func @transform_7(%arg0: i32, %arg1: i32, %arg2: i32) -> (i32, i32, i32) {
    %c1_i32 = arith.constant 1 : i32
    %0 = arith.muli %arg1, %c1_i32 : i32
    %1 = arith.addi %0, %arg2 : i32
    %c0_i32 = arith.constant 0 : i32
    %c0_i32_0 = arith.constant 0 : i32
    return %arg0, %c0_i32, %1 : i32, i32, i32
  }
  func.func @transform_8(%arg0: i32, %arg1: i32, %arg2: i32) -> (i32, i32, i32) {
    %c1_i32 = arith.constant 1 : i32
    %0 = arith.muli %arg1, %c1_i32 : i32
    %1 = arith.addi %0, %arg2 : i32
    %c0_i32 = arith.constant 0 : i32
    %c0_i32_0 = arith.constant 0 : i32
    return %arg0, %c0_i32, %1 : i32, i32, i32
  }
  func.func @transform_9(%arg0: i32, %arg1: i32, %arg2: i32) -> (i32, i32, i32) {
    %c1_i32 = arith.constant 1 : i32
    %0 = arith.muli %arg1, %c1_i32 : i32
    %1 = arith.addi %0, %arg2 : i32
    %c0_i32 = arith.constant 0 : i32
    %c0_i32_0 = arith.constant 0 : i32
    return %arg0, %c0_i32, %1 : i32, i32, i32
  }
  func.func @transform_10(%arg0: i32, %arg1: i32, %arg2: i32) -> (i32, i32, i32, i32) {
    %c0_i32 = arith.constant 0 : i32
    %c0_i32_0 = arith.constant 0 : i32
    %c0_i32_1 = arith.constant 0 : i32
    return %arg0, %arg1, %c0_i32, %c0_i32_0 : i32, i32, i32, i32
  }
}

</mosaic_0001>

<bundles_post_ra>
// kernel: tpu_custom_call.1
= control target key start
LH: loop header
LB: loop body
LE: loop exit
PB: predicated region body
PF: predicated region fallthrough
CT: control target
= control target key end

     0   :  { %s1599_s0 = inlined_call_operand.vmem [shape: f32[2,3,256], index: 0, kind: input, shape index: {}]   ;;  %s1600_s1 = inlined_call_operand.vmem [shape: f32[2,3,256], index: 1, kind: input, shape index: {}]   ;;  %s1601_s2 = inlined_call_operand.vmem [shape: f32[2,3,256], index: 2, kind: input, shape index: {}]   ;;  %s1602_s3 = inlined_call_operand.vmem [shape: f32[2,6,256], index: 3, kind: input, shape index: {}]   ;;  %s1603_s4 = inlined_call_operand.vmem [shape: f32[2,6,256], index: 4, kind: input, shape index: {}]   ;;  %s1604_s5 = inlined_call_operand.vmem [shape: f32[2,6,256], index: 5, kind: input, shape index: {}]   ;;  %s1605_s6 = inlined_call_operand.vmem [shape: f32[2,1,256], index: 6, kind: input, shape index: {}]   ;;  %s1606_s7 = inlined_call_operand.vmem [shape: f32[2,1,256], index: 7, kind: input, shape index: {}]   ;;  %s1607_s8 = inlined_call_operand.vmem [shape: s8[2,1,256], index: 8, kind: input, shape index: {}]   ;;  %s1608_s9 = inlined_call_operand.vmem [shape: f32[2,1,256], index: 9, kind: input, shape index: {}]   ;;  %s1609_s10 = inlined_call_operand.hbm [shape: f32[2,1,1,256], index: 10, kind: output, shape index: {}]  }
   0x1   :  { %1618 = sst [smem:[#allocation12_spill]] %s1599_s0 }
   0x2   :  { %15 = vsyncpa [#allocation3], 0 }
   0x3   :  { %17 = vsyncpa [#allocation3 + $0x1], 0  ;;  %s1438_s13 = smov 0   ;;  %s1440_s14 = smov 0  }
   0x4   :  { %s1442_s15 = smov 0   ;;  %s1444_s16 = smov 0  }
   0x5   :  { %s1446_s17 = smov 0   ;;  %s1448_s18 = smov 0  }
   0x6 LB: > { %1619 = sst [smem:[#allocation5_spill]] %s1357_s13  ;;  %s1209_s19 = sadd.s32 4294967295, %s1377_s18   ;;  %s1377_s18 = sphi %s1448_s18, %s23_s18   ;;  %s1373_s17 = sphi %s1446_s17, %s1638_s17   ;;  %s1369_s16 = sphi %s1444_s16, %s1637_s16   ;;  %s1365_s15 = sphi %s1442_s15, %s1641_s15   ;;  %s1361_s14 = sphi %s1440_s14, %s1640_s14   ;;  %s1357_s13 = sphi %s1438_s13, %s1639_s13  }
   0x7   : > { %1620 = sst [smem:[#allocation6_spill]] %s1365_s15  ;;  %s1210_s20 = sadd.s32 4294967294, %s1377_s18  }
   0x8   : > { %1621 = sst [smem:[#allocation7_spill]] %s1373_s17  ;;  %s42_s21 = sadd.s32 1, %s1373_s17 }
   0x9   : > { %1622 = sst [smem:[#allocation8_spill]] %s1377_s18  ;;  %s351_s22 = sadd.s32 1, %s1365_s15 }
   0xa   : > { %p44_p0 = scmp.ge.s32.totalorder %s42_s21, 2  ;;  %p361_p1 = scmp.ne.s32.totalorder %s1365_s15, %s1361_s14 }
   0xb   : > { %p362_p2 = scmp.eq.s32.totalorder %s1209_s19, 1  ;;  %p367_p3 = scmp.ne.s32.totalorder %s1361_s14, %s1357_s13 }
   0xc   : > { %s1643_s21 = smov (%p44_p0, %s42_s21), 0  ;;  %p368_p5 = scmp.eq.s32.totalorder %s1210_s20, 1 }
   0xd   : > { %1623 = sst [smem:[#allocation9_spill]] %s1643_s21  ;;  %p1478_p4 = por %p362_p2, %p361_p1 }
   0xe   : > { %s346_s24 = ssub.s32 %s1373_s17, %s1643_s21  ;;  %p1213_p6 = scmp.ge.s32.totalorder %s1377_s18, 1 }
   0xf   : > { %p349_p7 = scmp.eq.s32.totalorder %s346_s24, 0  ;;  %p1485_p8 = por %p368_p5, %p367_p3 }
  0x10   : > { %p532_p9 = scmp.lt.s32.totalorder %s1377_s18, 3 }
  0x11   : > { %s1625_s25 = scalar_select %p1485_p8, 1, 0 }
  0x12   : > { %s1491_s26 = scalar_select %p349_p7, %s1365_s15, %s351_s22  }
  0x13   : > { %1626 = sst [smem:[#allocation10_spill]] %s1625_s25  ;;  %p533_p10 = pnand %p1213_p6, %p532_p9 }
  0x14   : > { %1627 = sst [smem:[#allocation11_spill]] %s1491_s26  ;;  %s1610_s27 = sand.u32 (!%p533_p10), 1, %s1361_s14  }
  0x15   : > { %536 = sbr.rel (%p533_p10) target bundleno = 93 (0x5d), region = 60  ;;  %p663_p11 = scmp.lt.s32.totalorder (!%p533_p10), %s1369_s16, 1 }
  0x16   : > { %s1214_s28 = sshll.u32 (!%p533_p10), %s1610_s27, 1  ;;  %s1630_s0 = sld [smem:[#allocation12_spill]] (!%p533_p10) }
  0x17   : > { %s1502_s30 = scalar_lea.vmem (!%p533_p10), [#allocation2], %s1214_s28  ;;  %s1242_s19 = sshll.u32 (!%p533_p10), %s1369_s16, 5 }
  0x18   : > { %s1631_s15 = sand.u32 (!%p533_p10), 1, %s1361_s14   ;;  %s1382_s25 = smov (!%p533_p10), [#allocation2]  }
  0x1a   : > { %v839_v0 = vlaneseq  ;;  %v1379_v1 = vmov 286326784   ;;  %s664_s29 = scalar_select %p663_p11, %s1369_s16, 1  ;;  %v1380_v4 = vmov 0.0   ;;  %vm787_vm1 = vcmask 1042432  }
  0x1b   : > { %v837_v2 = vunpack.c.l.s4 %v1379_v1  ;;  %vm814_vm2 = vcmask 1045504   ;;  %v1381_v51 = vmov 1966171168   ;;  %s1305_s16 = sshll.u32 %s1382_s25, 4  ;;  %s1306_s16 = int_to_ptr.vmem [resolvable:$false] %s1305_s16 }
  0x1c   : > { %vm1497_vm0 = vcmp.lt.s32.totalorder %v839_v0, 256  ;;  %s1236_s11 = sshll.u32 %s664_s29, 3  ;;  %s1239_s12 = sshll.u32 %s664_s29, 4  ;;  %v1513_v6 = vshrl.u32 %v839_v0, 7  ;;  %v871_v52 = vunpack.c.l.s4 %v1381_v51 }
  0x1d   : > { %937 = vst.msk [vmem:[%s1502_s30] sm:$0x3] %vm1497_vm0, %v1380_v4  ;;  %s670_s22 = scalar_lea.vmem %s1630_s0, %s1236_s11  ;;  %s682_s21 = scalar_lea.vmem %s1600_s1, %s1236_s11  ;;  %v838_v5 = vunpack.c.0.s8 %v837_v2 }
  0x1e   : > { %s694_s26 = scalar_lea.vmem %s1601_s2, %s1236_s11  ;;  %s706_s13 = scalar_lea.vmem %s1602_s3, %s1239_s12  ;;  %v778_v7 = vld [vmem:[%s670_s22] sm:$0x77]  ;;  %v861_v60 = vsub.s32 4, %v1513_v6  ;;  %v872_v62 = vunpack.c.0.s8 %v871_v52 }
  0x1f   : > { %v779_v8 = vld [vmem:[%s682_s21] sm:$0x77]  ;;  %s718_s20 = scalar_lea.vmem %s1603_s4, %s1239_s12  ;;  %s730_s24 = scalar_lea.vmem %s1604_s5, %s1239_s12  ;;  %v803_v11 = vld [vmem:[%s706_s13 + $0x8] sm:$0x3f]  ;;  %v841_v17 = vsub.s32 %v838_v5, %v1513_v6  ;;  %v857_v5 = vsub.s32 0, %v1513_v6 }
  0x20   : > { %v780_v9 = vsub.f32 %v778_v7, %v779_v8  ;;  %v781_v10 = vld [vmem:[%s694_s26] sm:$0x77]  ;;  %s1527_s17 = sshll.u32 %s664_s29, 1  ;;  %v805_v13 = vld [vmem:[%s718_s20 + $0x8] sm:$0x3f]  ;;  %s964_s21 = scalar_lea.sflag [#allocation3], %s1631_s15 }
  0x21   : > { %v802_v12 = vld [vmem:[%s706_s13] sm:$0x3f]  ;;  %v809_v14 = vld [vmem:[%s730_s24 + $0x8] sm:$0x3f]  ;;  %s741_s18 = scalar_lea.vmem %s1605_s6, %s1527_s17  ;;  %s752_s0 = scalar_lea.vmem %s1606_s7, %s1527_s17  ;;  %v807_v16 = vsub.f32 %v803_v11, %v805_v13 }
  0x22   : > { %v782_v15 = vmul.f32 %v781_v10, %v780_v9  ;;  %v804_v18 = vld [vmem:[%s718_s20] sm:$0x3f]  ;;  %s763_s29 = scalar_lea.vmem %s1607_s8, %s1527_s17  ;;  %s774_s28 = scalar_lea.vmem %s1608_s9, %s1527_s17  ;;  %v875_v10 = vsub.s32 %v872_v62, %v1513_v6 }
  0x23   : > { %v808_v19 = vld [vmem:[%s730_s24] sm:$0x3f]  ;;  %v806_v22 = vsub.f32 %v802_v12, %v804_v18  ;;  %v811_v24 = vmul.f32 %v809_v14, %v807_v16  ;;  %s980_s20 = sshll.u32 %s1502_s30, 4  ;;  %s978_s17 = scalar_lea.hbm %s1609_s10, %s1242_s19  ;;  %s981_s20 = int_to_ptr.vmem [resolvable:$true] %s980_s20 }
  0x24   : > { %v829_v20 = vld [vmem:[%s741_s18] sm:$0x3]  ;;  %v783_v23 = vmul.f32 %v782_v15, %v780_v9  ;;  %s1301_s18 = scalar_lea.vmem %s981_s20, 32  ;;  %s1307_s11 = scalar_lea.vmem %s1306_s16, 64 }
  0x25   : > { %v830_v21 = vld [vmem:[%s752_s0] sm:$0x3]  ;;  %v810_v28 = vmul.f32 %v808_v19, %v806_v22  ;;  %v813_v30 = vmul.f32 %v811_v24, %v807_v16  ;;  %p1302_p12 = scmp.ne.s32.totalorder %s981_s20, %s1301_s18  ;;  %p1308_p1 = scmp.lt.s32.totalorder %s981_s20, %s1306_s16 }
  0x26   : > { %v831_v25 = vsub.f32 %v829_v20, %v830_v21  ;;  %v832_v26 = vld [vmem:[%s763_s29] sm:$0x3]  ;;  %v785_v29 = vcombine.high %v783_v23, %v783_v23  ;;  %v788_v32 = vsel %vm787_vm1, %v783_v23, 0.0  ;;  %p1309_p2 = scmp.lt.s32.totalorder %s1307_s11, %s1301_s18 }
  0x27   : > { %v833_v27 = vunpack.c.0.s8 %v832_v26  ;;  %v789_v34 = vrot.slane %v788_v32, 4  ;;  %v812_v35 = vmul.f32 %v810_v28, %v806_v22  ;;  %v822_v37 = vsel %vm814_vm2, %v813_v30, 0.0  ;;  %v777_v14 = vld [vmem:[%s774_s28] sm:$0x3]  ;;  %p1303_p13 = pnand %p1302_p12, %p1478_p4 }
  0x28   : > { %v842_v31 = vrot.slane %v831_v25, %v841_v17  ;;  %v795_v36 = vsel %vm787_vm1, %v785_v29, 0.0  ;;  %v823_v39 = vrot.slane %v822_v37, 4  ;;  %v886_v19 = vmul.f32 %v777_v14, %v777_v14  ;;  %p1310_p3 = por %p1309_p2, %p1308_p1 }
  0x29   : > { %v834_v33 = vcvt.s32.f32 %v833_v27  ;;  %v796_v38 = vrot.slane %v795_v36, 4  ;;  %v790_v40 = vadd.f32 %v789_v34, %v788_v32  ;;  %v815_v42 = vsel %vm814_vm2, %v812_v35, 0.0  ;;  %v938_v35 = vld [vmem:[%s1502_s30] sm:$0x3]  ;;  %p1304_p0 = pneg %p1303_p13 }
  0x2a   : > { %v824_v44 = vadd.f32 %v823_v39, %v822_v37  ;;  %v816_v46 = vrot.slane %v815_v42, 4  ;;  %v887_v23 = vmul.f32 0.010405827, %v886_v19  ;;  %v923_v29 = vsub.s32 1, %v1513_v6 }
  0x2b   : > { %v844_v41 = vmul.f32 %v842_v31, %v834_v33  ;;  %v797_v43 = vadd.f32 %v796_v38, %v795_v36  ;;  %v791_v45 = vrot.slane %v790_v40, 2  ;;  %p1311_p5 = pnand %p1310_p3, %p1304_p0 }
  0x2c   : > { %v825_v48 = vrot.slane %v824_v44, 2  ;;  %v817_v53 = vadd.f32 %v816_v46, %v815_v42 }
  0x2d   : > { %v798_v47 = vrot.slane %v797_v43, 2  ;;  %v792_v49 = vadd.f32 %v791_v45, %v790_v40  ;;  %v845_v50 = vmul.f32 %v844_v41, %v842_v31 }
  0x2e   : > { %v826_v55 = vadd.f32 %v825_v48, %v824_v44  ;;  %v818_v57 = vrot.slane %v817_v53, 2 }
  0x2f   : > { %v799_v54 = vadd.f32 %v798_v47, %v797_v43  ;;  %v793_v56 = vrot.slane %v792_v49, 1  ;;  %v853_v61 = vmul.f32 0.32258064, %v845_v50  ;;  %v895_v20 = vrot.slane %v845_v50, %v875_v10 }
  0x30   : > { %v827_v59 = vrot.slane %v826_v55, 1  ;;  %v819_v0 = vadd.f32 %v818_v57, %v817_v53 }
  0x31   : > { %v800_v58 = vrot.slane %v799_v54, 1  ;;  %v794_v63 = vadd.f32 %v793_v56, %v792_v49  ;;  %v862_v9 = vrot.slane %v853_v61, %v861_v60  ;;  %v858_v16 = vrot.slane %v853_v61, %v857_v5 }
  0x32   : > { %v828_v2 = vadd.f32 %v827_v59, %v826_v55  ;;  %v820_v4 = vrot.slane %v819_v0, 1  ;;  %v902_v24 = vrot.slane %v895_v20, %v875_v10 }
  0x33   : > { %v801_v1 = vadd.f32 %v800_v58, %v799_v54  ;;  %v847_v12 = vmul.f32 0.10752688, %v794_v63 }
  0x34   : > { %v850_v8 = vmul.f32 0.05376344, %v828_v2  ;;  %v821_v11 = vadd.f32 %v820_v4, %v819_v0  ;;  %v904_v27 = vmul.f32 %v902_v24, %v887_v23 }
  0x35   : > { %v848_v7 = vmul.f32 0.10752688, %v801_v1 }
  0x36   : > { %v849_v15 = vmul.f32 0.05376344, %v821_v11 }
  0x37   : > { %v852_v13 = vadd.f32 %v850_v8, %v848_v7 }
  0x38   : > { %v851_v18 = vadd.f32 %v849_v15, %v847_v12 }
  0x39   : > { %v866_v17 = vadd.f32 %v862_v9, %v852_v13 }
  0x3a   : > { %v865_v21 = vadd.f32 %v858_v16, %v851_v18 }
  0x3c   : > { %v869_v22 = vcombine.low %v865_v21, %v866_v17 }
  0x3e   : > { %v876_v25 = vrot.slane %v869_v22, %v875_v10 }
  0x40   : > { %v883_v26 = vrot.slane %v876_v25, %v875_v10 }
  0x42   : > { %v885_v28 = vmul.f32 %v883_v26, %v777_v14 }
  0x44   : > { %v905_v30 = vsub.f32 %v885_v28, %v904_v27 }
  0x46   : > { %v920_v31 = vrot.slane %v905_v30, %v857_v5  ;;  %v924_v32 = vrot.slane %v905_v30, %v923_v29 }
  0x48   : > { %v941_v33 = vcombine.low %v920_v31, %v924_v32 }
  0x4a   : > { %v948_v34 = vrot.slane %v941_v33, %v875_v10 }
  0x4c   : > { %v955_v36 = vrot.slane %v948_v34, %v875_v10 }
  0x4e   : > { %v957_v37 = vadd.f32 %v955_v36, %v938_v35 }
  0x50   : > { %962 = vst.msk [vmem:[%s1502_s30] sm:$0x3] %vm1497_vm0, %v957_v37 }
  0x51   : > { %1314 = shalt.err (!%p1311_p5)
}
  0x52   : > { %s1315_s0 = scalar_lea.hbm %s978_s17, 32  ;;  %s1319_s26 = scalar_lea.hbm %s1609_s10, 64 }
  0x53   : > { %p1316_p6 = scmp.ne.s32.totalorder %s978_s17, %s1315_s0  ;;  %p1320_p10 = scmp.lt.s32.totalorder %s978_s17, %s1609_s10 }
  0x54   : > { %p1321_p11 = scmp.lt.s32.totalorder %s1319_s26, %s1315_s0 }
  0x55   : > { %p1317_p7 = pnand %p1316_p6, %p1478_p4 }
  0x56   : > { %p1322_p12 = por %p1321_p11, %p1320_p10 }
  0x57   : > { %p1318_p9 = pneg %p1317_p7 }
  0x59   : > { %p1323_p13 = pnand %p1322_p12, %p1318_p9 }
  0x5b   : > { %1326 = shalt.err (!%p1323_p13)
}
  0x5c   : > { %1243 = dma.vmem_to_hbm [thread:$0]  (%p1478_p4), %s981_s20, 32, %s978_s17, %s964_s21  }
  0x5d PF: > { %s1632_s22 = sld [smem:[#allocation8_spill]] }
  0x5e   : > { %s1633_s28 = sld [smem:[#allocation5_spill]] }
  0x63   : > { %p1249_p0 = scmp.ge.s32.totalorder %s1632_s22, 2 }
  0x64   : > { %s992_s27 = sand.u32 1, %s1633_s28  }
  0x65   : > { %p1246_p1 = pnand %p1249_p0, %p1485_p8  ;;  %s993_s24 = scalar_lea.sflag [#allocation3], %s992_s27 }
  0x67   : > { %p1247_p2 = pneg %p1246_p1 }
  0x69   : > { %1352 = dma.done.wait (%p1247_p2), %s993_s24, 32  }
  0x6a   : > { %1354 = vsyncadd (%p1247_p2), %s993_s24, 4294967264  ;;  %s23_s18 = sadd.s32 1, %s1632_s22   ;;  %s1635_s15 = sld [smem:[#allocation6_spill]] }
  0x6b   : > { %p20_p3 = scmp.ge.s32.totalorder %s23_s18, 4   ;;  %s1636_s25 = sld [smem:[#allocation11_spill]] }
  0x6c   : > { %s1637_s16 = sld [smem:[#allocation7_spill]]  ;;  %s1639_s13 = smov %s1361_s14 }
  0x6d   : > { %s1638_s17 = sld [smem:[#allocation9_spill]]  ;;  %22 = sbr.rel (!%p20_p3) target bundleno = 6 (0x6), region = 126 }
  0x70   : > { %s1640_s14 = smov %s1635_s15 }
  0x71   : > { %s1641_s15 = smov %s1636_s25 }
  0x72   :  { %998 = vsyncpa [#allocation3], 1 }
  0x73   :  { %1000 = vsyncpa [#allocation3 + $0x1], 1 }

</bundles_post_ra>
